<compile_context>
chip_gen: v6e
topology: v6e:2x2x1
jax: 0.10.0
libtpu: 0.0.40
codegen_flags: <defaults>
</compile_context>

<pallas_src>
import math

import jax
import jax.numpy as jnp
from jax.experimental import pallas as pl
from jax.experimental.pallas import tpu as pltpu

LANE = 128  # lane-tile width used for the concatenated band matrices


# ----------------------------------------------------------------------------
# Kernel: conv1 -> tanh -> BN -> (pool1+conv2) -> tanh -> BN ->
#         (pool2+Linear1) -> ReLU -> Linear2, as 4 MXU matmuls + VPU/EUP/XLU.
# ----------------------------------------------------------------------------
def _cnn_kernel(x_ref, hm_ref, a_ref, m_ref, sc_ref,
                wl1_ref, bl1_ref, wl2_ref, bl2_ref, o_ref):
    eps = 1e-5
    f32 = jnp.float32
    bf16 = jnp.bfloat16

    BH = x_ref.shape[0]            # B * H (rows, sublane axis)
    W = x_ref.shape[1]             # input width (conv1 output width)
    W1 = wl1_ref.shape[0]          # width after AvgPool #1 (conv2 output width)
    stride_a = a_ref.shape[1] // 3
    stride_m = m_ref.shape[1] // 3

    mask_up = hm_ref[0]            # (BH, 1): 0 on h == 0 rows (and wrap rows)
    mask_dn = hm_ref[1]            # (BH, 1): 0 on h == H-1 rows (and wrap rows)

    def shift_sum(t, stride, width, bias):
        # t = [t0 | t1 | t2] along lanes (each tap at a 128-aligned offset).
        # out[r] = mask_up[r]*t0[r-1] + t1[r] + mask_dn[r]*t2[r+1] + bias
        t0 = t[:, 0:width]
        t1 = t[:, stride:stride + width]
        t2 = t[:, 2 * stride:2 * stride + width]
        up = mask_up * pltpu.roll(t0, shift=1, axis=0)        # row r <- r-1
        dn = mask_dn * pltpu.roll(t2, shift=BH - 1, axis=0)    # row r <- r+1
        return up + t1 + dn + bias

    def batchnorm(y, gamma, beta):
        # Training-mode BatchNorm2d(1): biased batch stats over the whole
        # tensor, one-pass variance, affine folded into a single FMA.
        m = jnp.mean(y)
        q = jnp.mean(y * y)
        a = gamma * jax.lax.rsqrt(q - m * m + eps)
        return y * a + (beta - m * a)

    x = x_ref[...]                                             # (BH, W) f32

    # ---- Conv2d(1, 1, (3, 13), padding='same'): one matmul vs [A0|A1|A2] ----
    t = jnp.dot(x.astype(bf16), a_ref[...], preferred_element_type=f32)
    y = shift_sum(t, stride_a, W, sc_ref[0])                   # + conv1 bias

    # ---- Tanh + BatchNorm2d(1) ----
    y = batchnorm(jnp.tanh(y), sc_ref[1], sc_ref[2])

    # ---- AvgPool2d((1,3)) #1 fused into Conv2d(1, 1, (3, 3), 'same'):
    #      one matmul vs [M0|M1|M2] (M_k = pool1 @ band(w2[k])) ----
    u = jnp.dot(y.astype(bf16), m_ref[...], preferred_element_type=f32)
    z = shift_sum(u, stride_m, W1, sc_ref[3])                  # + conv2 bias

    # ---- Tanh + BatchNorm2d(1) ----
    z = batchnorm(jnp.tanh(z), sc_ref[4], sc_ref[5])

    # ---- AvgPool2d((1,3)) #2 fused into Linear1 (wl1_ref = p2 @ wl1),
    #      ReLU, Linear2 (output padded to lane-dense 128 columns) ----
    h = jnp.maximum(
        jnp.dot(z.astype(bf16), wl1_ref[...], preferred_element_type=f32)
        + bl1_ref[...], 0.0)
    o_ref[...] = (jnp.dot(h.astype(bf16), wl2_ref[...],
                          preferred_element_type=f32)
                  + bl2_ref[...])


def cnn_forward(x, ops, out_dim):
    hmask, a_cat, m_cat, scalars, wl1f, bl1, wl2p, bl2p = ops
    B, H, W = x.shape
    BH = B * H
    out_pad = wl2p.shape[1]

    vmem = pl.BlockSpec(memory_space=pltpu.MemorySpace.VMEM)
    smem = pl.BlockSpec(memory_space=pltpu.MemorySpace.SMEM)

    out2d = pl.pallas_call(
        _cnn_kernel,
        out_shape=jax.ShapeDtypeStruct((BH, out_pad), jnp.float32),
        in_specs=[vmem, vmem, vmem, vmem, smem, vmem, vmem, vmem, vmem],
        out_specs=vmem,
    )(x.reshape(BH, W), hmask, a_cat, m_cat, scalars, wl1f, bl1, wl2p, bl2p)
    # TODO(synk): for large B*H, add a row-block grid (block 256-512 rows) with
    # dimension_semantics=("parallel",) and constant index_maps for the weight
    # operands; the BatchNorm batch statistics are global over (B,H,W) so they
    # then need an explicit cross-tile reduction, and the per-step VMEM budget
    # must be re-derived against v7x's 64 MiB (vmem_limit_bytes).
    return out2d[:, :out_dim].reshape(B, H, out_dim)


# ----------------------------------------------------------------------------
# Wrapper-side precomputation of the fused operands (plain JAX, one-time).
# ----------------------------------------------------------------------------
def _pool_matrix(n, k=3):
    m = n // k
    rows = jnp.arange(m * k)
    cols = jnp.repeat(jnp.arange(m), k)
    return jnp.zeros((n, m), jnp.float32).at[rows, cols].set(1.0 / k)


def _band_matrix(w_row, width, pad):
    """(width, width) matrix A with A[i, j] = w_row[i - j + pad] (zero outside)."""
    klen = w_row.shape[0]
    i = jnp.arange(width)[:, None]
    j = jnp.arange(width)[None, :]
    idx = i - j + pad
    valid = (idx >= 0) & (idx < klen)
    return jnp.where(valid, w_row[jnp.clip(idx, 0, klen - 1)], 0.0).astype(jnp.float32)


def _concat_lane_aligned(mats):
    """Concatenate along N, placing each block at a 128-aligned column offset
    so the kernel's per-tap result slices are lane-tile-local (no cross-tile
    lane shifts)."""
    k, n = mats[0].shape
    assert n <= LANE, "per-tap block must fit one lane tile"
    out = jnp.zeros((k, LANE * len(mats)), jnp.float32)
    for i, m in enumerate(mats):
        out = out.at[:, i * LANE:i * LANE + n].set(m)
    return out


def prepare_inputs(params, B, H, W, out_pad=128):
    W1 = W // 3
    BH = B * H
    p1 = _pool_matrix(W)        # (W,  W//3)
    p2 = _pool_matrix(W1)       # (W//3, W//9)

    # Conv1 (3,13) W-taps as banded (W, W) matrices ('same', pad=6), one block
    # per kernel row, concatenated along N (lane-tile-aligned).
    a_cat = _concat_lane_aligned(
        [_band_matrix(params["w1"][kh], W, 6) for kh in range(3)])

    # AvgPool #1 fused into conv2's (3,3) W-taps ('same', pad=1), concatenated.
    m_cat = _concat_lane_aligned(
        [p1 @ _band_matrix(params["w2"][kh], W1, 1) for kh in range(3)])

    # Per-row H-boundary masks (replace the old (BH, BH) shift matrices):
    # the kernel uses sublane rolls and zeroes wrapped / out-of-image rows.
    h = jnp.arange(BH) % H
    hmask = jnp.stack([(h >= 1).astype(jnp.float32)[:, None],
                       (h <= H - 2).astype(jnp.float32)[:, None]])   # (2, BH, 1)

    scalars = jnp.stack([params["b1"], params["g1"], params["be1"],
                         params["b2"], params["g2"], params["be2"]]).astype(jnp.float32)

    # AvgPool #2 fused into Linear1; Linear2 padded to lane-dense 128 columns.
    wl1f = p2 @ params["wl1"]
    out_dim = params["wl2"].shape[1]
    wl2p = jnp.zeros((params["wl2"].shape[0], out_pad),
                     jnp.float32).at[:, :out_dim].set(params["wl2"])
    bl2p = jnp.zeros((1, out_pad), jnp.float32).at[:, :out_dim].set(params["bl2"])

    # MXU operands in bf16 (activations are cast at the dot sites in-kernel);
    # biases and all elementwise math stay f32.
    return (hmask,
            a_cat.astype(jnp.bfloat16), m_cat.astype(jnp.bfloat16),
            scalars,
            wl1f.astype(jnp.bfloat16),
            params["bl1"].astype(jnp.float32),
            wl2p.astype(jnp.bfloat16), bl2p)


# ----------------------------------------------------------------------------
# Parameter init (matches the PyTorch module's shapes / default inits) and a
# pure-JAX f32 reference of the original tap-loop forward for validation.
# ----------------------------------------------------------------------------
def init_params(key, W, hidden, out_dim):
    in_feats = W // 9
    ks = jax.random.split(key, 8)

    def u(k, shape, fan_in):
        b = 1.0 / math.sqrt(fan_in)
        return jax.random.uniform(k, shape, jnp.float32, -b, b)

    return dict(
        w1=u(ks[0], (3, 13), 3 * 13), b1=u(ks[1], (), 3 * 13),
        w2=u(ks[2], (3, 3), 3 * 3),   b2=u(ks[3], (), 3 * 3),
        g1=jnp.float32(1.0), be1=jnp.float32(0.0),     # BatchNorm affine init
        g2=jnp.float32(1.0), be2=jnp.float32(0.0),
        wl1=u(ks[4], (in_feats, hidden), in_feats),
        bl1=u(ks[5], (1, hidden), in_feats),
        wl2=u(ks[6], (hidden, out_dim), hidden),
        bl2=u(ks[7], (1, out_dim), hidden),
    )


def reference(x, params):
    """Pure-JAX reference of the PyTorch forward (float32)."""
    w1, b1, w2, b2 = params["w1"], params["b1"], params["w2"], params["b2"]
    g1, be1, g2, be2 = params["g1"], params["be1"], params["g2"], params["be2"]
    wl1, bl1, wl2, bl2 = params["wl1"], params["bl1"], params["wl2"], params["bl2"]

    def conv_same(x, w, b):
        kh, kw = w.shape
        xp = jnp.pad(x, ((0, 0), (kh // 2, kh // 2), (kw // 2, kw // 2)))
        out = jnp.zeros_like(x) + b
        for i in range(kh):
            for j in range(kw):
                out = out + w[i, j] * xp[:, i:i + x.shape[1], j:j + x.shape[2]]
        return out

    def bn(x, g, be):
        m = jnp.mean(x)
        v = jnp.mean((x - m) ** 2)
        return g * (x - m) / jnp.sqrt(v + 1e-5) + be

    def pool3(x):
        B, H, W = x.shape
        w3 = W // 3
        return x[:, :, :w3 * 3].reshape(B, H, w3, 3).mean(-1)

    y = pool3(bn(jnp.tanh(conv_same(x, w1, b1)), g1, be1))
    z = pool3(bn(jnp.tanh(conv_same(y, w2, b2)), g2, be2))
    B, H, W2 = z.shape
    f = z.reshape(B * H, W2)
    h = jnp.maximum(f @ wl1 + bl1, 0.0)
    o = h @ wl2 + bl2
    return o.reshape(B, H, -1)


if __name__ == "__main__":
    # Small shapes consistent with the module:
    # input_size = (H, W) = (8, 36), hidden_size = 32, out_size = (8, 8).
    B, H, W = 2, 8, 36
    hidden, out_dim = 32, 8

    key = jax.random.PRNGKey(0)
    kx, kp = jax.random.split(key)
    x = jax.random.normal(kx, (B, H, W), jnp.float32)
    params = init_params(kp, W, hidden, out_dim)
    ops = prepare_inputs(params, B, H, W)

    out = jax.block_until_ready(cnn_forward(x, ops, out_dim))

    ref = reference(x, params)
    assert out.shape == (B, H, out_dim), out.shape
    err = float(jnp.max(jnp.abs(out - ref)))
    # bf16 MXU operands (per perf review) vs. an f32 reference; the PyTorch
    # module is nominally f64 (no TPU f64 path), so compare with 2e-2 tol.
    assert jnp.allclose(out, ref, atol=2e-2, rtol=2e-2), err
    print("KERNEL_OK")
</pallas_src>

<mosaic_0001>
module attributes {stable_mosaic.version = 11 : i64} {
  func.func @_cnn_kernel(%arg0: memref<16x36xf32, #tpu.memory_space<vmem>>, %arg1: memref<2x16x1xf32, #tpu.memory_space<vmem>>, %arg2: memref<36x384xbf16, #tpu.memory_space<vmem>>, %arg3: memref<36x384xbf16, #tpu.memory_space<vmem>>, %arg4: memref<6xf32, #tpu.memory_space<smem>>, %arg5: memref<12x32xbf16, #tpu.memory_space<vmem>>, %arg6: memref<1x32xf32, #tpu.memory_space<vmem>>, %arg7: memref<32x128xbf16, #tpu.memory_space<vmem>>, %arg8: memref<1x128xf32, #tpu.memory_space<vmem>>, %arg9: memref<16x128xf32, #tpu.memory_space<vmem>>) attributes {dimension_semantics = [], scalar_prefetch = 0 : i64, scratch_operands = 0 : i64, tpu.core_type = #tpu.core_type<tc>} {
    %c0 = arith.constant 0 : index
    %c0_0 = arith.constant 0 : index
    %c0_1 = arith.constant 0 : index
    %0 = vector.load %arg1[%c0, %c0_0, %c0_1] : memref<2x16x1xf32, #tpu.memory_space<vmem>>, vector<1x16x1xf32>
    %1 = vector.shape_cast %0 : vector<1x16x1xf32> to vector<16x1xf32>
    %c1 = arith.constant 1 : index
    %c0_2 = arith.constant 0 : index
    %c0_3 = arith.constant 0 : index
    %2 = vector.load %arg1[%c1, %c0_2, %c0_3] : memref<2x16x1xf32, #tpu.memory_space<vmem>>, vector<1x16x1xf32>
    %3 = vector.shape_cast %2 : vector<1x16x1xf32> to vector<16x1xf32>
    %c0_4 = arith.constant 0 : index
    %c0_5 = arith.constant 0 : index
    %4 = vector.load %arg0[%c0_4, %c0_5] : memref<16x36xf32, #tpu.memory_space<vmem>>, vector<16x36xf32>
    %5 = arith.truncf %4 : vector<16x36xf32> to vector<16x36xbf16>
    %c0_6 = arith.constant 0 : index
    %c0_7 = arith.constant 0 : index
    %6 = vector.load %arg2[%c0_6, %c0_7] : memref<36x384xbf16, #tpu.memory_space<vmem>>, vector<36x384xbf16>
    %cst = arith.constant dense<0.000000e+00> : vector<16x384xf32>
    %7 = tpu.matmul %5, %6, %cst {dimension_numbers = #tpu.dot_dimension_numbers<[1], [0], [0], [1], [0, 0, 1, 1], [], []>} : vector<16x36xbf16>, vector<36x384xbf16>, vector<16x384xf32> -> vector<16x384xf32>
    %c0_8 = arith.constant 0 : index
    %8 = memref.load %arg4[%c0_8] : memref<6xf32, #tpu.memory_space<smem>>
    %9 = vector.extract_strided_slice %7 {offsets = [0, 0], sizes = [16, 36], strides = [1, 1]} : vector<16x384xf32> to vector<16x36xf32>
    %10 = vector.extract_strided_slice %7 {offsets = [0, 128], sizes = [16, 36], strides = [1, 1]} : vector<16x384xf32> to vector<16x36xf32>
    %11 = vector.extract_strided_slice %7 {offsets = [0, 256], sizes = [16, 36], strides = [1, 1]} : vector<16x384xf32> to vector<16x36xf32>
    %c1_i32 = arith.constant 1 : i32
    %12 = tpu.dynamic_rotate %9 by %c1_i32 dim 0 : vector<16x36xf32>, i32 -> vector<16x36xf32>
    %13 = vector.broadcast %1 : vector<16x1xf32> to vector<16x36xf32>
    %14 = arith.mulf %13, %12 : vector<16x36xf32>
    %c15_i32 = arith.constant 15 : i32
    %15 = tpu.dynamic_rotate %11 by %c15_i32 dim 0 : vector<16x36xf32>, i32 -> vector<16x36xf32>
    %16 = vector.broadcast %3 : vector<16x1xf32> to vector<16x36xf32>
    %17 = arith.mulf %16, %15 : vector<16x36xf32>
    %18 = arith.addf %14, %10 : vector<16x36xf32>
    %19 = arith.addf %18, %17 : vector<16x36xf32>
    %20 = vector.broadcast %8 : f32 to vector<16x36xf32>
    %21 = arith.addf %19, %20 : vector<16x36xf32>
    %22 = math.tanh %21 : vector<16x36xf32>
    %c1_9 = arith.constant 1 : index
    %23 = memref.load %arg4[%c1_9] : memref<6xf32, #tpu.memory_space<smem>>
    %c2 = arith.constant 2 : index
    %24 = memref.load %arg4[%c2] : memref<6xf32, #tpu.memory_space<smem>>
    %25 = vector.shape_cast %22 : vector<16x36xf32> to vector<1x16x36xf32>
    %cst_10 = arith.constant dense<0.000000e+00> : vector<1xf32>
    %26 = vector.multi_reduction <add>, %25, %cst_10 [1, 2] : vector<1x16x36xf32> to vector<1xf32>
    %27 = vector.shape_cast %26 : vector<1xf32> to vector<1x1x1xf32>
    %28 = vector.extract %27[0, 0, 0] : f32 from vector<1x1x1xf32>
    %cst_11 = arith.constant 5.760000e+02 : f32
    %29 = arith.divf %28, %cst_11 : f32
    %30 = arith.mulf %22, %22 : vector<16x36xf32>
    %31 = vector.shape_cast %30 : vector<16x36xf32> to vector<1x16x36xf32>
    %cst_12 = arith.constant dense<0.000000e+00> : vector<1xf32>
    %32 = vector.multi_reduction <add>, %31, %cst_12 [1, 2] : vector<1x16x36xf32> to vector<1xf32>
    %33 = vector.shape_cast %32 : vector<1xf32> to vector<1x1x1xf32>
    %34 = vector.extract %33[0, 0, 0] : f32 from vector<1x1x1xf32>
    %cst_13 = arith.constant 5.760000e+02 : f32
    %35 = arith.divf %34, %cst_13 : f32
    %36 = arith.mulf %29, %29 : f32
    %37 = arith.subf %35, %36 : f32
    %cst_14 = arith.constant 9.99999974E-6 : f32
    %38 = arith.addf %37, %cst_14 : f32
    %39 = math.rsqrt %38 : f32
    %40 = arith.mulf %23, %39 : f32
    %41 = vector.broadcast %40 : f32 to vector<16x36xf32>
    %42 = arith.mulf %22, %41 : vector<16x36xf32>
    %43 = arith.mulf %29, %40 : f32
    %44 = arith.subf %24, %43 : f32
    %45 = vector.broadcast %44 : f32 to vector<16x36xf32>
    %46 = arith.addf %42, %45 : vector<16x36xf32>
    %47 = arith.truncf %46 : vector<16x36xf32> to vector<16x36xbf16>
    %c0_15 = arith.constant 0 : index
    %c0_16 = arith.constant 0 : index
    %48 = vector.load %arg3[%c0_15, %c0_16] : memref<36x384xbf16, #tpu.memory_space<vmem>>, vector<36x384xbf16>
    %cst_17 = arith.constant dense<0.000000e+00> : vector<16x384xf32>
    %49 = tpu.matmul %47, %48, %cst_17 {dimension_numbers = #tpu.dot_dimension_numbers<[1], [0], [0], [1], [0, 0, 1, 1], [], []>} : vector<16x36xbf16>, vector<36x384xbf16>, vector<16x384xf32> -> vector<16x384xf32>
    %c3 = arith.constant 3 : index
    %50 = memref.load %arg4[%c3] : memref<6xf32, #tpu.memory_space<smem>>
    %51 = vector.extract_strided_slice %49 {offsets = [0, 0], sizes = [16, 12], strides = [1, 1]} : vector<16x384xf32> to vector<16x12xf32>
    %52 = vector.extract_strided_slice %49 {offsets = [0, 128], sizes = [16, 12], strides = [1, 1]} : vector<16x384xf32> to vector<16x12xf32>
    %53 = vector.extract_strided_slice %49 {offsets = [0, 256], sizes = [16, 12], strides = [1, 1]} : vector<16x384xf32> to vector<16x12xf32>
    %c1_i32_18 = arith.constant 1 : i32
    %54 = tpu.dynamic_rotate %51 by %c1_i32_18 dim 0 : vector<16x12xf32>, i32 -> vector<16x12xf32>
    %55 = vector.broadcast %1 : vector<16x1xf32> to vector<16x12xf32>
    %56 = arith.mulf %55, %54 : vector<16x12xf32>
    %c15_i32_19 = arith.constant 15 : i32
    %57 = tpu.dynamic_rotate %53 by %c15_i32_19 dim 0 : vector<16x12xf32>, i32 -> vector<16x12xf32>
    %58 = vector.broadcast %3 : vector<16x1xf32> to vector<16x12xf32>
    %59 = arith.mulf %58, %57 : vector<16x12xf32>
    %60 = arith.addf %56, %52 : vector<16x12xf32>
    %61 = arith.addf %60, %59 : vector<16x12xf32>
    %62 = vector.broadcast %50 : f32 to vector<16x12xf32>
    %63 = arith.addf %61, %62 : vector<16x12xf32>
    %64 = math.tanh %63 : vector<16x12xf32>
    %c4 = arith.constant 4 : index
    %65 = memref.load %arg4[%c4] : memref<6xf32, #tpu.memory_space<smem>>
    %c5 = arith.constant 5 : index
    %66 = memref.load %arg4[%c5] : memref<6xf32, #tpu.memory_space<smem>>
    %67 = vector.shape_cast %64 : vector<16x12xf32> to vector<1x16x12xf32>
    %cst_20 = arith.constant dense<0.000000e+00> : vector<1xf32>
    %68 = vector.multi_reduction <add>, %67, %cst_20 [1, 2] : vector<1x16x12xf32> to vector<1xf32>
    %69 = vector.shape_cast %68 : vector<1xf32> to vector<1x1x1xf32>
    %70 = vector.extract %69[0, 0, 0] : f32 from vector<1x1x1xf32>
    %cst_21 = arith.constant 1.920000e+02 : f32
    %71 = arith.divf %70, %cst_21 : f32
    %72 = arith.mulf %64, %64 : vector<16x12xf32>
    %73 = vector.shape_cast %72 : vector<16x12xf32> to vector<1x16x12xf32>
    %cst_22 = arith.constant dense<0.000000e+00> : vector<1xf32>
    %74 = vector.multi_reduction <add>, %73, %cst_22 [1, 2] : vector<1x16x12xf32> to vector<1xf32>
    %75 = vector.shape_cast %74 : vector<1xf32> to vector<1x1x1xf32>
    %76 = vector.extract %75[0, 0, 0] : f32 from vector<1x1x1xf32>
    %cst_23 = arith.constant 1.920000e+02 : f32
    %77 = arith.divf %76, %cst_23 : f32
    %78 = arith.mulf %71, %71 : f32
    %79 = arith.subf %77, %78 : f32
    %cst_24 = arith.constant 9.99999974E-6 : f32
    %80 = arith.addf %79, %cst_24 : f32
    %81 = math.rsqrt %80 : f32
    %82 = arith.mulf %65, %81 : f32
    %83 = vector.broadcast %82 : f32 to vector<16x12xf32>
    %84 = arith.mulf %64, %83 : vector<16x12xf32>
    %85 = arith.mulf %71, %82 : f32
    %86 = arith.subf %66, %85 : f32
    %87 = vector.broadcast %86 : f32 to vector<16x12xf32>
    %88 = arith.addf %84, %87 : vector<16x12xf32>
    %89 = arith.truncf %88 : vector<16x12xf32> to vector<16x12xbf16>
    %c0_25 = arith.constant 0 : index
    %c0_26 = arith.constant 0 : index
    %90 = vector.load %arg5[%c0_25, %c0_26] : memref<12x32xbf16, #tpu.memory_space<vmem>>, vector<12x32xbf16>
    %cst_27 = arith.constant dense<0.000000e+00> : vector<16x32xf32>
    %91 = tpu.matmul %89, %90, %cst_27 {dimension_numbers = #tpu.dot_dimension_numbers<[1], [0], [0], [1], [0, 0, 1, 1], [], []>} : vector<16x12xbf16>, vector<12x32xbf16>, vector<16x32xf32> -> vector<16x32xf32>
    %c0_28 = arith.constant 0 : index
    %c0_29 = arith.constant 0 : index
    %92 = vector.load %arg6[%c0_28, %c0_29] : memref<1x32xf32, #tpu.memory_space<vmem>>, vector<1x32xf32>
    %93 = vector.broadcast %92 : vector<1x32xf32> to vector<16x32xf32>
    %94 = arith.addf %91, %93 : vector<16x32xf32>
    %cst_30 = arith.constant 0.000000e+00 : f32
    %95 = vector.broadcast %cst_30 : f32 to vector<16x32xf32>
    %96 = arith.maximumf %94, %95 : vector<16x32xf32>
    %97 = arith.truncf %96 : vector<16x32xf32> to vector<16x32xbf16>
    %c0_31 = arith.constant 0 : index
    %c0_32 = arith.constant 0 : index
    %98 = vector.load %arg7[%c0_31, %c0_32] : memref<32x128xbf16, #tpu.memory_space<vmem>>, vector<32x128xbf16>
    %cst_33 = arith.constant dense<0.000000e+00> : vector<16x128xf32>
    %99 = tpu.matmul %97, %98, %cst_33 {dimension_numbers = #tpu.dot_dimension_numbers<[1], [0], [0], [1], [0, 0, 1, 1], [], []>} : vector<16x32xbf16>, vector<32x128xbf16>, vector<16x128xf32> -> vector<16x128xf32>
    %c0_34 = arith.constant 0 : index
    %c0_35 = arith.constant 0 : index
    %100 = vector.load %arg8[%c0_34, %c0_35] : memref<1x128xf32, #tpu.memory_space<vmem>>, vector<1x128xf32>
    %101 = vector.broadcast %100 : vector<1x128xf32> to vector<16x128xf32>
    %102 = arith.addf %99, %101 : vector<16x128xf32>
    %c0_36 = arith.constant 0 : index
    %c0_37 = arith.constant 0 : index
    %103 = vector.load %arg9[%c0_36, %c0_37] : memref<16x128xf32, #tpu.memory_space<vmem>>, vector<16x128xf32>
    tpu.vector_store %arg9[%c0_36, %c0_37], %102 {strides = array<i32>} : memref<16x128xf32, #tpu.memory_space<vmem>>, vector<16x128xf32>,
    return
  }
}

</mosaic_0001>

<bundles_post_ra>
// kernel: tpu_custom_call.1
= control target key start
LH: loop header
LB: loop body
LE: loop exit
PB: predicated region body
PF: predicated region fallthrough
CT: control target
= control target key end

     0   :  { %14 = vsyncpa [#allocation3], 0  ;;  %s1117_s0 = inlined_call_operand.vmem [shape: f32[16,36], index: 0, kind: input, shape index: {}]   ;;  %s1118_s1 = inlined_call_operand.vmem [shape: f32[2,16,1], index: 1, kind: input, shape index: {}]   ;;  %s1119_s2 = inlined_call_operand.hbm [shape: bf16[36,384], index: 2, kind: input, shape index: {}]   ;;  %s1120_s3 = inlined_call_operand.hbm [shape: bf16[36,384], index: 3, kind: input, shape index: {}]   ;;  %s1121_s4 = inlined_call_operand.vmem [shape: f32[6], index: 4, kind: input, shape index: {}]   ;;  %s1122_s5 = inlined_call_operand.vmem [shape: bf16[12,32], index: 5, kind: input, shape index: {}]   ;;  %s1123_s6 = inlined_call_operand.vmem [shape: f32[1,32], index: 6, kind: input, shape index: {}]   ;;  %s1124_s7 = inlined_call_operand.vmem [shape: bf16[32,128], index: 7, kind: input, shape index: {}]   ;;  %s1125_s8 = inlined_call_operand.vmem [shape: f32[1,128], index: 8, kind: input, shape index: {}]   ;;  %s1126_s9 = inlined_call_operand.hbm [shape: f32[16,128], index: 9, kind: output, shape index: {}]  }
   0x1   :  { %15 = vsyncpa [#allocation7], 0 }
   0x2   :  { %16 = vsyncpa [#allocation5], 0 }
   0x3   :  { %17 = vsyncpa [#allocation4], 0  ;;  %s927_s30 = smov [#allocation2]  }
   0x4   :  { %s27_s10 = sshll.u32 %s927_s30, 4  ;;  %s28_s10 = int_to_ptr.vmem [resolvable:$true] %s27_s10 }
   0x5   :  { %s855_s11 = scalar_lea.vmem %s28_s10, 960  ;;  %p860_p1 = scmp.lt.s32.totalorder %s28_s10, %s28_s10 }
   0x6   :  { %p856_p0 = scmp.ne.s32.totalorder %s28_s10, %s855_s11  ;;  %p861_p2 = scmp.lt.s32.totalorder %s855_s11, %s855_s11 }
   0x8   :  { %p862_p3 = por %p861_p2, %p860_p1 }
   0xa   :  { %p863_p4 = pnand %p862_p3, %p856_p0 }
   0xc   :  { %866 = shalt.err (!%p863_p4)
}
   0xd   :  { %s928_s12 = smov 192   ;;  %s929_s13 = smov 12  }
   0xe   :  { %33 = dma.hbm_to_vmem [thread:$0]  %s1119_s2, 960, %s28_s10, [#allocation3], %s928_s12, %s928_s12, %s929_s13  }
   0xf   :  { %s930_s16 = smov [#allocation6]   ;;  %s52_s20 = sshll.u32 %s1121_s4, 4  ;;  %s53_s20 = int_to_ptr.vmem [resolvable:$true] %s52_s20 }
  0x10   :  { %s39_s17 = sshll.u32 %s930_s16, 4  ;;  %s40_s17 = int_to_ptr.vmem [resolvable:$true] %s39_s17 }
  0x11   :  { %s875_s21 = scalar_lea.vmem %s40_s17, 960  ;;  %p880_p6 = scmp.lt.s32.totalorder %s40_s17, %s40_s17 }
  0x12   :  { %p876_p5 = scmp.ne.s32.totalorder %s40_s17, %s875_s21  ;;  %p881_p7 = scmp.lt.s32.totalorder %s875_s21, %s875_s21 }
  0x14   :  { %p882_p8 = por %p881_p7, %p880_p6 }
  0x16   :  { %p883_p9 = pnand %p882_p8, %p876_p5 }
  0x18   :  { %886 = shalt.err (!%p883_p9)
}
  0x19   :  { %45 = dma.hbm_to_vmem [thread:$0]  %s1120_s3, 960, %s40_s17, [#allocation7], %s928_s12, %s928_s12, %s929_s13  }
  0x1a   :  { %s887_s2 = scalar_lea.vmem %s53_s20, 16  ;;  %p892_p11 = scmp.lt.s32.totalorder %s53_s20, %s53_s20 }
  0x1b   :  { %p888_p10 = scmp.ne.s32.totalorder %s53_s20, %s887_s2  ;;  %p893_p12 = scmp.lt.s32.totalorder %s887_s2, %s887_s2 }
  0x1d   :  { %p894_p13 = por %p893_p12, %p892_p11 }
  0x1f   :  { %p895_p0 = pnand %p894_p13, %p888_p10 }
  0x21   :  { %898 = shalt.err (!%p895_p0)
}
  0x22   :  { %s931_s4 = smov [#allocation8]  }
  0x23   :  { %55 = dma.vmem_to_smem %s53_s20, 16, %s931_s4, [#allocation5]  }
  0x24   :  { %919 = dma.done.wait [#allocation3], 960  }
  0x25   :  { %920 = vsyncadd [#allocation3], 4294966336 }
  0x26   :  { %921 = dma.done.wait [#allocation7], 960  }
  0x27   :  { %922 = vsyncadd [#allocation7], 4294966336 }
  0x28   :  { %923 = dma.done.wait [#allocation5], 16  }
  0x29   :  { %924 = vsyncadd [#allocation5], 4294967280 }
  0x2a   :  { %73 = sfence }
  0x2b   :  { %v91_v0 = vld [vmem:[#allocation2 + $0x30] sm:$0x33]  ;;  %vm137_vm0 = vcmask 1041408   ;;  %v932_v2 = vmov 0.0   ;;  %v813_v5 = vld [vmem:[#allocation2 + $0x1c] ss:$12 sps:$4 sm:$0xff]   ;;  %v234_v21 = vlaneseq }
  0x2c   :  { %v709_v1 = vcombine.high %v91_v0, %v91_v0  ;;  %751 = vmatprep.subr.bf16.mxu1 %v932_v2  ;;  %v708_v3 = vcombine.low %v91_v0, %v91_v0  ;;  %v812_v4 = vld [vmem:[#allocation2 + $0x38] ss:$0 sps:$4 sm:$0x33]   ;;  %v933_v6 = vmov 0   ;;  %v816_v10 = vld [vmem:[#allocation2 + $0x20] ss:$12 sps:$4 sm:$0xff]  }
  0x2d   :  { %179 = vmatprep.mubr.bf16.mxu0 %v933_v6  ;;  %808 = vset.pattern.permute.xlu0 %v933_v6  ;;  %v145_v8 = vsel %vm137_vm0, %v812_v4, 0  ;;  %v815_v9 = vld [vmem:[#allocation2 + $0x18] ss:$12 sps:$4 sm:$0xff]   ;;  %v819_v12 = vld [vmem:[#allocation2] ss:$12 sps:$4 sm:$0xff]   ;;  %vm934_vm1 = vmmov 0  }
  0x2e   :  { %711 = vmatprep.subr.msk.bf16.mxu0 %vm137_vm0, %v709_v1  ;;  %v139_v7 = vsel %vm137_vm0, %v708_v3, 0  ;;  %809 = vset.pattern.permute.xlu1 %v933_v6  ;;  %v817_v11 = vld [vmem:[#allocation2 + $0x4] ss:$12 sps:$4 sm:$0xff]   ;;  %v820_v13 = vld [vmem:[#allocation2 + $0x8] ss:$12 sps:$4 sm:$0xff]   ;;  %v701_v19 = vld [vmem:[%s1118_s1 + $0x18] sm:$0xff] }
  0x2f   :  { %158 = vmatpush1.bf16.msra.mxu0 %v139_v7  ;;  %752 = vmatpush3.bf16.msra.mxu1 %v145_v8  ;;  %v80_v14 = vld [vmem:[%s1117_s0] sm:$0xff]  ;;  %v700_v16 = vld [vmem:[%s1118_s1 + $0x10] sm:$0xff]  ;;  %v81_v17 = vld [vmem:[%s1117_s0 + $0x8] sm:$0xff]  ;;  %vm133_vm2 = vcmask 293888   ;;  %v1028_v24 = vshrl.u32 %v234_v21, 7  ;;  %s231_s0 = sld [smem:[#allocation8]] }
  0x30   :  { %159 = vmatprep.subr.bf16.mxu0 %v813_v5  ;;  %753 = vmatprep.subr.bf16.mxu1 %v932_v2  ;;  %v75_v15 = vld [vmem:[%s1118_s1] sm:$0xff]  ;;  %v76_v18 = vld [vmem:[%s1118_s1 + $0x8] sm:$0xff]  ;;  %v82_v20 = vpack.c.bf16 %v81_v17, %v80_v14  ;;  %s714_s20 = sld [smem:[#allocation8 + $0x1]]  ;;  %vm497_vm5 = vcmask 97280   ;;  %vm563_vm6 = vcmask 1045504   ;;  %vm634_vm7 = vcmask 261120  }
  0x31   :  { %757 = vmatprep.mubr.msk.bf16.mxu1 %vm934_vm1, %v932_v2  ;;  %241 = vperm.xlu0 %808, %v75_v15   ;;  %vm236_vm3 = vcmp.lt.s32.totalorder %v1028_v24, 1  ;;  %vm253_vm4 = vcmp.lt.s32.totalorder %v1028_v24, 7  ;;  %v335_v8 = vld [vmem:[#allocation6 + $0x30] sm:$0x33]  ;;  %v824_v21 = vld [vmem:[#allocation6 + $0x18] ss:$12 sps:$4 sm:$0xff]  }
  0x32   :  { %258 = vperm.xlu1 %809, %v700_v16   ;;  %s715_s21 = sld [smem:[#allocation8 + $0x2]] }
  0x33   :  { %160 = vmatpush1.bf16.msra.mxu0 %v815_v9  ;;  %754 = vmatpush3.bf16.msra.mxu1 %v816_v10  ;;  %v723_v9 = vcombine.high %v335_v8, %v335_v8  ;;  %v722_v10 = vcombine.low %v335_v8, %v335_v8  ;;  %s728_s3 = sld [smem:[#allocation8 + $0x3]] }
  0x34   :  { %161 = vmatprep.subr.bf16.mxu0 %v817_v11  ;;  %755 = vmatprep.subr.bf16.mxu1 %v932_v2  ;;  %v823_v11 = vld [vmem:[#allocation6 + $0x38] ss:$0 sps:$4 sm:$0x33]   ;;  %s729_s12 = sld [smem:[#allocation8 + $0x4]] }
  0x35   :  { %246 = vperm.xlu0 %808, %v76_v18   ;;  %v272_v49 = vstv %s231_s0  ;;  %v381_v14 = vsel %vm137_vm0, %v722_v10, 0  ;;  %v387_v15 = vsel %vm137_vm0, %v823_v11, 0  ;;  %v826_v18 = vld [vmem:[#allocation6 + $0x1c] ss:$12 sps:$4 sm:$0xff]   ;;  %s730_s13 = sld [smem:[#allocation8 + $0x5]] }
  0x36   :  { %263 = vperm.xlu1 %809, %v701_v19  }
  0x37   :  { %162 = vmatpush1.bf16.msra.mxu0 %v819_v12  ;;  %756 = vmatpush3.bf16.msra.mxu1 %v820_v13 }
  0x38   :  { %761 = vmatprep.subr.bf16.mxu1 %v932_v2  ;;  %725 = vmatprep.subr.msk.bf16.mxu0 %vm137_vm0, %v723_v9 }
  0x3a   :  { %712 = vmatmul.mubr.msk.bf16.vlgmr.msra.gmra.mxu0 %vm133_vm2, %v82_v20  ;;  %758 = vmatmul.mubr.msk.bf16.vlgmr.msra.gmra.mxu1 %vm133_vm2, %v82_v20 }
  0x3b   :  { %421 = vmatprep.mubr.bf16.mxu0 %v933_v6  ;;  %767 = vmatprep.mubr.msk.bf16.mxu1 %vm934_vm1, %v932_v2 }
  0x3c   :  { %400 = vmatpush1.bf16.msra.mxu0 %v381_v14  ;;  %762 = vmatpush3.bf16.msra.mxu1 %v387_v15 }
  0x3d   :  { %763 = vmatprep.subr.bf16.mxu1 %v932_v2  ;;  %401 = vmatprep.subr.bf16.mxu0 %v826_v18 }
  0x40   :  { %402 = vmatpush1.bf16.msra.mxu0 %v824_v21 }
  0xac   :  { %v1030_v25 = vpop.permute.xlu0 %241 }
  0xad   :  { %v1032_v26 = vpop.permute.xlu1 %258 }
  0xb0   :  { %v1036_v36 = vpop.permute.xlu0 %246 }
  0xb1   :  { %v1044_v40 = vpop.permute.xlu1 %263 }
  0xfa   :  { %v181_v22 = vpop.f32.mrf.mxu0  ;;  %v224_v23 = vpop.f32.mrf.mxu1 }
  0xfb   :  { %v251_v29 = vrot.slane %v224_v23, 1  ;;  %v232_v32 = vrot.slane %v181_v22, 7  ;;  %v827_v22 = vld [vmem:[#allocation6 + $0x20] ss:$12 sps:$4 sm:$0xff]  }
  0xfc   :  { %v183_v27 = vpop.f32.mrf.mxu0  ;;  %v759_v28 = vpop.f32.mrf.mxu1  ;;  %764 = vmatpush3.bf16.msra.mxu1 %v827_v22 }
  0xfd   :  { %765 = vmatprep.subr.bf16.mxu1 %v932_v2  ;;  %v828_v28 = vld [vmem:[#allocation6] ss:$12 sps:$4 sm:$0xff]  }
  0xfe   :  { %v185_v30 = vpop.f32.mrf.mxu0  ;;  %v227_v31 = vpop.f32.mrf.mxu1 }
  0xff   :  { %v233_v33 = vrot.slane %v185_v30, 7  ;;  %v252_v34 = vrot.slane %v227_v31, 1 }
 0x100   :  { %v760_v35 = vpop.f32.mrf.mxu1  ;;  %v187_v44 = vpop.f32.mrf.mxu0 }
 0x101   :  { %v238_v37 = vsel %vm236_vm3, %v233_v33, %v232_v32  ;;  %v254_v38 = vsel %vm253_vm4, %v251_v29, %v252_v34  ;;  %v255_v39 = vsel %vm253_vm4, %v252_v34, %v251_v29  ;;  %v237_v41 = vsel %vm236_vm3, %v232_v32, %v233_v33  ;;  %v831_v29 = vld [vmem:[#allocation6 + $0x8] ss:$12 sps:$4 sm:$0xff]  }
 0x102   :  { %v249_v42 = vmul.f32 %v1030_v25, %v238_v37  ;;  %v250_v43 = vmul.f32 %v1036_v36, %v237_v41  ;;  %v266_v46 = vmul.f32 %v1032_v26, %v254_v38  ;;  %v267_v47 = vmul.f32 %v1044_v40, %v255_v39  ;;  %766 = vmatpush3.bf16.msra.mxu1 %v831_v29 }
 0x103   :  { %777 = vmatprep.subr.bf16.mxu1 %v932_v2 }
 0x104   :  { %v268_v45 = vadd.f32 %v249_v42, %v183_v27  ;;  %v269_v48 = vadd.f32 %v250_v43, %v187_v44  ;;  %v830_v27 = vld [vmem:[#allocation6 + $0x4] ss:$12 sps:$4 sm:$0xff]  }
 0x105   :  { %403 = vmatprep.subr.bf16.mxu0 %v830_v27  ;;  %v832_v27 = vld [vmem:[%s1122_s5] sm:$0x3f]  }
 0x106   :  { %v270_v50 = vadd.f32 %v268_v45, %v266_v46  ;;  %v271_v51 = vadd.f32 %v269_v48, %v267_v47  ;;  %404 = vmatpush1.bf16.msra.mxu0 %v828_v28  ;;  %v565_v28 = vsel %vm563_vm6, %v832_v27, 0 }
 0x107   :  { %771 = vmatprep.subr.bf16.mxu0 %v932_v2 }
 0x108   :  { %v273_v52 = vadd.f32 %v272_v49, %v270_v50  ;;  %v274_v53 = vadd.f32 %v272_v49, %v271_v51 }
 0x10a   :  { %835 = vtanh.f32 %v273_v52 }
 0x10b   :  { %837 = vtanh.f32 %v274_v53 }
 0x117   :  { %v1052_v54 = vpop.eup %835 }
 0x118   :  { %v1054_v55 = vpop.eup %837  ;;  %v279_v56 = vsel %vm133_vm2, %v1052_v54, 0.0  ;;  %v294_v57 = vmul.f32 %v1052_v54, %v1052_v54 }
 0x119   :  { %v280_v58 = vsel %vm133_vm2, %v1054_v55, 0.0  ;;  %v295_v59 = vmul.f32 %v1054_v55, %v1054_v55 }
 0x11a   :  { %v281_v60 = vadd.f32 %v280_v58, %v279_v56  ;;  %v296_v61 = vsel %vm133_vm2, %v294_v57, 0.0 }
 0x11b   :  { %v297_v62 = vsel %vm133_vm2, %v295_v59, 0.0 }
 0x11c   :  { %282 = vadd.xlane.f32.xlu0 %v281_v60  ;;  %v298_v63 = vadd.f32 %v297_v62, %v296_v61 }
 0x11e   :  { %299 = vadd.xlane.f32.xlu1 %v298_v63  ;;  %v490_v63 = vstv %s728_s3 }
 0x1a5   :  { %v283_v0 = vpop.xlane.xlu0 %282 }
 0x1a6   :  { %v284_v1 = vrot.slane %v283_v0, 4 }
 0x1a7   :  { %v300_v3 = vpop.xlane.xlu1 %299 }
 0x1a8   :  { %v285_v4 = vadd.f32 %v284_v1, %v283_v0  ;;  %v301_v5 = vrot.slane %v300_v3, 4 }
 0x1aa   :  { %v286_v6 = vrot.slane %v285_v4, 2  ;;  %v302_v7 = vadd.f32 %v301_v5, %v300_v3 }
 0x1ac   :  { %v303_v12 = vrot.slane %v302_v7, 2  ;;  %v287_v13 = vadd.f32 %v286_v6, %v285_v4 }
 0x1ae   :  { %v304_v16 = vadd.f32 %v303_v12, %v302_v7  ;;  %v288_v17 = vrot.slane %v287_v13, 1 }
 0x1b0   :  { %v289_v19 = vadd.f32 %v288_v17, %v287_v13  ;;  %v305_v20 = vrot.slane %v304_v16, 1 }
 0x1b2   :  { %785 = vpush %v289_v19  ;;  %v306_v23 = vadd.f32 %v305_v20, %v304_v16 }
 0x1b4   :  { %787 = vpush %v306_v23 }
 0x1e3   :  { %s786_s1 = spop %785 }
 0x1e4   :  { %s293_s14 = smul.f32 0.0017361111, %s786_s1 }
 0x1e5   :  { %s788_s15 = spop %787 }
 0x1e6   :  { %s311_s16 = smul.f32 %s293_s14, %s293_s14 }
 0x1e7   :  { %s310_s17 = smul.f32 0.0017361111, %s788_s15 }
 0x1e9   :  { %s312_s18 = ssub.f32 %s310_s17, %s311_s16 }
 0x1eb   :  { %s313_s19 = sadd.f32 1e-05, %s312_s18 }
 0x1ed   :  { %v314_v30 = vstv %s313_s19 }
 0x1ee   :  { %839 = vrsqrt.f32 %v314_v30 }
 0x1fb   :  { %v840_v31 = vpop.eup %839 }
 0x1fc   :  { %789 = vpush %v840_v31 }
 0x22d   :  { %s790_s22 = spop %789 }
 0x22e   :  { %s317_s23 = smul.f32 %s790_s22, %s714_s20 }
 0x230   :  { %v318_v32 = vstv %s317_s23  ;;  %s321_s2 = smul.f32 %s317_s23, %s293_s14 }
 0x231   :  { %v319_v33 = vmul.f32 %v1052_v54, %v318_v32  ;;  %v320_v34 = vmul.f32 %v1054_v55, %v318_v32 }
 0x232   :  { %s322_s4 = ssub.f32 %s715_s21, %s321_s2 }
 0x234   :  { %v323_v35 = vstv %s322_s4 }
 0x235   :  { %v324_v37 = vadd.f32 %v323_v35, %v319_v33  ;;  %v325_v38 = vadd.f32 %v323_v35, %v320_v34 }
 0x237   :  { %v326_v39 = vpack.c.bf16 %v325_v38, %v324_v37 }
 0x239   :  { %726 = vmatmul.mubr.msk.bf16.vlgmr.msra.gmra.mxu0 %vm133_vm2, %v326_v39  ;;  %768 = vmatmul.mubr.msk.bf16.vlgmr.msra.gmra.mxu1 %vm133_vm2, %v326_v39  ;;  %v833_v39 = vld [vmem:[%s1124_s7 + $0x8] sm:$0xff]  }
 0x23a   :  { %773 = vmatprep.mubr.msk.bf16.mxu0 %vm934_vm1, %v932_v2  ;;  %781 = vmatprep.mubr.msk.bf16.mxu1 %vm934_vm1, %v932_v2 }
 0x23b   :  { %772 = vmatpush3.bf16.msra.mxu0 %v565_v28  ;;  %778 = vmatpush3.bf16.msra.mxu1 %v833_v39 }
 0x23c   :  { %779 = vmatprep.subr.bf16.mxu1 %v932_v2  ;;  %v734_v2 = vld [vmem:[%s1125_s8] ss:$0 sm:$0xff] }
 0x2f9   :  { %v423_v41 = vpop.f32.mrf.mxu0  ;;  %v466_v42 = vpop.f32.mrf.mxu1 }
 0x2fa   :  { %v474_v47 = vrot.slane %v423_v41, 7  ;;  %v480_v48 = vrot.slane %v466_v42, 1  ;;  %v834_v41 = vld [vmem:[%s1124_s7] sm:$0xff]   ;;  %s935_s7 = smov [#allocation9]  }
 0x2fb   :  { %v425_v43 = vpop.f32.mrf.mxu0  ;;  %v769_v44 = vpop.f32.mrf.mxu1  ;;  %780 = vmatpush3.bf16.msra.mxu1 %v834_v41  ;;  %v731_v42 = vld [vmem:[%s1123_s6] ss:$0 sm:$0xff]  ;;  %s686_s23 = sshll.u32 %s935_s7, 4  ;;  %s687_s23 = int_to_ptr.vmem [resolvable:$true] %s686_s23 }
 0x2fc   :  { %s899_s6 = scalar_lea.vmem %s687_s23, 256  ;;  %p904_p2 = scmp.lt.s32.totalorder %s687_s23, %s687_s23 }
 0x2fd   :  { %v427_v45 = vpop.f32.mrf.mxu0  ;;  %v469_v46 = vpop.f32.mrf.mxu1  ;;  %p900_p1 = scmp.ne.s32.totalorder %s687_s23, %s899_s6  ;;  %p905_p3 = scmp.lt.s32.totalorder %s899_s6, %s899_s6 }
 0x2fe   :  { %v475_v49 = vrot.slane %v427_v45, 7  ;;  %v481_v50 = vrot.slane %v469_v46, 1 }
 0x2ff   :  { %v770_v51 = vpop.f32.mrf.mxu1  ;;  %v429_v58 = vpop.f32.mrf.mxu0  ;;  %p906_p4 = por %p905_p3, %p904_p2 }
 0x300   :  { %v477_v52 = vsel %vm236_vm3, %v475_v49, %v474_v47  ;;  %v482_v53 = vsel %vm253_vm4, %v480_v48, %v481_v50  ;;  %v483_v54 = vsel %vm253_vm4, %v481_v50, %v480_v48  ;;  %v476_v55 = vsel %vm236_vm3, %v474_v47, %v475_v49 }
 0x301   :  { %v478_v56 = vmul.f32 %v477_v52, %v1030_v25  ;;  %v479_v57 = vmul.f32 %v476_v55, %v1036_v36  ;;  %v484_v60 = vmul.f32 %v482_v53, %v1032_v26  ;;  %v485_v61 = vmul.f32 %v483_v54, %v1044_v40  ;;  %p907_p5 = pnand %p906_p4, %p900_p1 }
 0x303   :  { %v486_v59 = vadd.f32 %v478_v56, %v425_v43  ;;  %v487_v62 = vadd.f32 %v479_v57, %v429_v58 }
 0x305   :  { %v488_v0 = vadd.f32 %v486_v59, %v484_v60  ;;  %v489_v1 = vadd.f32 %v487_v62, %v485_v61 }
 0x307   :  { %v491_v3 = vadd.f32 %v490_v63, %v488_v0  ;;  %v492_v4 = vadd.f32 %v490_v63, %v489_v1 }
 0x309   :  { %841 = vtanh.f32 %v491_v3 }
 0x30a   :  { %843 = vtanh.f32 %v492_v4 }
 0x316   :  { %v842_v24 = vpop.eup %841 }
 0x317   :  { %v844_v5 = vpop.eup %843  ;;  %v498_v25 = vsel %vm497_vm5, %v842_v24, 0.0  ;;  %v513_v36 = vmul.f32 %v842_v24, %v842_v24 }
 0x318   :  { %v499_v6 = vsel %vm497_vm5, %v844_v5, 0.0  ;;  %v514_v7 = vmul.f32 %v844_v5, %v844_v5 }
 0x319   :  { %v500_v26 = vadd.f32 %v499_v6, %v498_v25  ;;  %v515_v40 = vsel %vm497_vm5, %v513_v36, 0.0 }
 0x31a   :  { %v516_v8 = vsel %vm497_vm5, %v514_v7, 0.0 }
 0x31b   :  { %501 = vadd.xlane.f32.xlu0 %v500_v26  ;;  %v517_v9 = vadd.f32 %v516_v8, %v515_v40 }
 0x31f   :  { %518 = vadd.xlane.f32.xlu0 %v517_v9 }
 0x3a4   :  { %v502_v10 = vpop.xlane.xlu0 %501 }
 0x3a5   :  { %v503_v11 = vrot.slane %v502_v10, 4 }
 0x3a7   :  { %v504_v12 = vadd.f32 %v503_v11, %v502_v10 }
 0x3a8   :  { %v519_v13 = vpop.xlane.xlu0 %518 }
 0x3a9   :  { %v505_v14 = vrot.slane %v504_v12, 2  ;;  %v520_v15 = vrot.slane %v519_v13, 4 }
 0x3ab   :  { %v521_v16 = vadd.f32 %v520_v15, %v519_v13  ;;  %v506_v17 = vadd.f32 %v505_v14, %v504_v12 }
 0x3ad   :  { %v522_v18 = vrot.slane %v521_v16, 2  ;;  %v507_v19 = vrot.slane %v506_v17, 1 }
 0x3af   :  { %v523_v20 = vadd.f32 %v522_v18, %v521_v16  ;;  %v508_v21 = vadd.f32 %v507_v19, %v506_v17 }
 0x3b1   :  { %791 = vpush %v508_v21  ;;  %v524_v22 = vrot.slane %v523_v20, 1 }
 0x3b3   :  { %v525_v23 = vadd.f32 %v524_v22, %v523_v20 }
 0x3b5   :  { %793 = vpush %v525_v23 }
 0x3e2   :  { %s792_s26 = spop %791 }
 0x3e3   :  { %s512_s27 = smul.f32 0.0052083335, %s792_s26 }
 0x3e5   :  { %s530_s28 = smul.f32 %s512_s27, %s512_s27 }
 0x3e6   :  { %s794_s29 = spop %793 }
 0x3e7   :  { %s529_s30 = smul.f32 0.0052083335, %s794_s29 }
 0x3e9   :  { %s531_s10 = ssub.f32 %s529_s30, %s530_s28 }
 0x3eb   :  { %s532_s11 = sadd.f32 1e-05, %s531_s10 }
 0x3ed   :  { %v533_v29 = vstv %s532_s11 }
 0x3ee   :  { %845 = vrsqrt.f32 %v533_v29 }
 0x3fb   :  { %v846_v30 = vpop.eup %845 }
 0x3fc   :  { %795 = vpush %v846_v30 }
 0x42d   :  { %s796_s0 = spop %795 }
 0x42e   :  { %s536_s1 = smul.f32 %s796_s0, %s729_s12 }
 0x430   :  { %v537_v31 = vstv %s536_s1  ;;  %s540_s5 = smul.f32 %s536_s1, %s512_s27 }
 0x431   :  { %v538_v32 = vmul.f32 %v842_v24, %v537_v31  ;;  %v539_v33 = vmul.f32 %v844_v5, %v537_v31 }
 0x432   :  { %s541_s14 = ssub.f32 %s730_s13, %s540_s5 }
 0x434   :  { %v542_v34 = vstv %s541_s14 }
 0x435   :  { %v543_v35 = vadd.f32 %v542_v34, %v538_v32  ;;  %v544_v37 = vadd.f32 %v542_v34, %v539_v33 }
 0x437   :  { %v545_v38 = vpack.c.bf16 %v544_v37, %v543_v35 }
 0x439   :  { %774 = vmatmul.mubr.msk.bf16.vlgmr.msra.gmra.mxu0 %vm497_vm5, %v545_v38 }
 0x4f9   :  { %v601_v43 = vpop.f32.mrf.mxu0 }
 0x4fa   :  { %v602_v45 = vadd.f32 %v731_v42, %v601_v43 }
 0x4fb   :  { %v775_v44 = vpop.f32.mrf.mxu0 }
 0x4fc   :  { %v608_v49 = vmax.f32 %v602_v45, 0.0 }
 0x4fd   :  { %v604_v46 = vpop.f32.mrf.mxu0 }
 0x4fe   :  { %v605_v47 = vadd.f32 %v731_v42, %v604_v46 }
 0x4ff   :  { %v776_v48 = vpop.f32.mrf.mxu0 }
 0x500   :  { %v609_v50 = vmax.f32 %v605_v47, 0.0 }
 0x502   :  { %v610_v51 = vpack.c.bf16 %v609_v50, %v608_v49 }
 0x504   :  { %782 = vmatmul.mubr.msk.bf16.vlgmr.msra.gmra.mxu1 %vm634_vm7, %v610_v51 }
 0x5c4   :  { %v672_v52 = vpop.f32.mrf.mxu1 }
 0x5c5   :  { %v673_v53 = vadd.f32 %v734_v2, %v672_v52 }
 0x5c6   :  { %v783_v54 = vpop.f32.mrf.mxu1 }
 0x5c7   :  { %679 = vst [vmem:[#allocation9] sm:$0xff] %v673_v53 }
 0x5c8   :  { %v675_v55 = vpop.f32.mrf.mxu1 }
 0x5c9   :  { %v676_v56 = vadd.f32 %v734_v2, %v675_v55 }
 0x5ca   :  { %v784_v57 = vpop.f32.mrf.mxu1 }
 0x5cb   :  { %680 = vst [vmem:[#allocation9 + $0x8] sm:$0xff] %v676_v56 }
 0x5cc   :  { %910 = shalt.err (!%p907_p5)
}
 0x5cd   :  { %s936_s2 = smov 128   ;;  %s937_s8 = smov 8  }
 0x5ce   :  { %692 = dma.vmem_to_hbm [thread:$0]  %s687_s23, 256, %s1126_s9, [#allocation4], %s936_s2, %s936_s2, %s937_s8  }
 0x5cf   :  { %925 = dma.done.wait [#allocation4], 256  }
 0x5d0   :  { %926 = vsyncadd [#allocation4], 4294967040 }
 0x5d1   :  { %696 = vsyncpa [#allocation3], 1 }
 0x5d2   :  { %697 = vsyncpa [#allocation7], 1 }
 0x5d3   :  { %698 = vsyncpa [#allocation4], 1 }
 0x5d4   :  { %699 = vsyncpa [#allocation5], 1 }

</bundles_post_ra>
